<compile_context>
chip_gen: v7x
topology: tpu7x:2x2x1
jax: 0.10.0
libtpu: 0.0.40
codegen_flags: <defaults>
</compile_context>

<pallas_src>
import jax
import jax.numpy as jnp
from jax.experimental import pallas as pl
from jax.experimental.pallas import tpu as pltpu


def _conv_gap_fc_kernel(x_ref, wslab_ref, bconv_ref, wfc_ref, bfc_ref, out_ref):
    # x_ref:     (1, G*H, 3*Wp*Cin)  bf16  row-im2col rows of G images
    # wslab_ref: (3*Wp*Cin, W*Cout)  bf16  block-Toeplitz conv weights (kh-major)
    # bconv_ref: (1, W*Cout)         f32   conv bias tiled over W
    # wfc_ref:   (W*Cout, NCP)       bf16  pool(1/HW) + classifier folded together
    # bfc_ref:   (1, NCP)            f32
    # out_ref:   (1, G, NCP)         f32   lane-dense (128-padded) logits block
    G = out_ref.shape[1]
    GH = x_ref.shape[1]
    H = GH // G
    WCout = wslab_ref.shape[1]

    # Conv2d(3x3, pad=1): ONE bf16 MXU pass (M = G*H, K = 3*Wp*Cin), f32 acc.
    acc = jnp.dot(x_ref[0], wslab_ref[...],
                  preferred_element_type=jnp.float32)          # (G*H, W*Cout)
    feat = jnp.maximum(acc + bconv_ref[...], 0.0)              # bias + ReLU, f32

    # Global average pool over H: per-image sum of H consecutive rows.  H is a
    # multiple of 8 so the reshape is sublane-tile aligned (no relayout); the
    # 1/(H*W) scale and the W-direction reduction are folded into wfc_ref.
    colsum = jnp.sum(feat.reshape(G, H, WCout), axis=1)        # (G, W*Cout) f32

    # Pool-over-W + classifier fused into one matmul (lane-dense padded N).
    logits = jnp.dot(colsum.astype(wfc_ref.dtype), wfc_ref[...],
                     preferred_element_type=jnp.float32) + bfc_ref[...]
    out_ref[...] = logits[None]                                # (1, G, NCP)


def _build_toeplitz_conv_weight(w_conv, W):
    """w_conv: (Cout, Cin, 3, 3) -> (3, (W+2)*Cin, W*Cout) block-Toeplitz slabs.

    slab[kh, (w+kw)*Cin + c, w*Cout + co] = w_conv[co, c, kh, kw]
    so that  conv_out[h, w, co] = sum_kh  x_padrow[h+kh] @ slab[kh].
    """
    Cout, Cin = w_conv.shape[0], w_conv.shape[1]
    Wp = W + 2
    T = jnp.transpose(w_conv, (2, 3, 1, 0)).astype(jnp.float32)   # (3,3,Cin,Cout)
    wp = jnp.arange(Wp)
    wo = jnp.arange(W)
    kw = wp[:, None] - wo[None, :]                                # (Wp, W)
    valid = (kw >= 0) & (kw < 3)
    kwc = jnp.clip(kw, 0, 2)
    slab = T[:, kwc]                                              # (3, Wp, W, Cin, Cout)
    slab = jnp.where(valid[None, :, :, None, None], slab, 0.0)
    slab = jnp.transpose(slab, (0, 1, 3, 2, 4))                   # (3, Wp, Cin, W, Cout)
    return slab.reshape(3, Wp * Cin, W * Cout)


def _pick_group(B, H):
    """Images per grid step: aim for G*H ~= 256 MXU rows, keep >= 2 steps."""
    target = max(1, 256 // H)
    if B >= 2:
        return max(1, min(target, B // 2))
    return 1


def model_forward(x_nchw, params):
    """Forward pass of the (representative) inner model on NCHW input."""
    # TODO(synk): is_feat / preact flags of the delegated inner model are not
    # modeled here (the wrapper's forward just forwards them).
    w_conv, b_conv, w_fc, b_fc = params
    B, Cin, H, W = x_nchw.shape
    Cout = w_conv.shape[0]
    NC = w_fc.shape[0]
    Hp, Wp = H + 2, W + 2
    HW = H * W
    K3 = 3 * Wp * Cin                         # folded conv contraction length
    NCP = ((NC + 127) // 128) * 128           # lane-dense padded class dim

    G = _pick_group(B, H)                     # images per grid step
    nblocks = -(-B // G)                      # ceil(B / G)
    B_pad = nblocks * G

    # Row-im2col input: for each output row h, lane-concat the three padded
    # input rows h, h+1, h+2 (kh-major).  bf16 MXU operand.
    x_nhwc = jnp.transpose(x_nchw, (0, 2, 3, 1)).astype(jnp.float32)
    x_pad = jnp.pad(x_nhwc, ((0, 0), (1, 1), (1, 1), (0, 0)))
    x_pad = x_pad.reshape(B, Hp, Wp * Cin)
    x_rows = jnp.stack([x_pad[:, kh:kh + H, :] for kh in range(3)], axis=2)
    x_rows = x_rows.reshape(B, H, K3)
    if B_pad > B:
        x_rows = jnp.pad(x_rows, ((0, B_pad - B), (0, 0), (0, 0)))
    x_rows = x_rows.reshape(nblocks, G * H, K3).astype(jnp.bfloat16)

    # Conv weights: kh-major block-Toeplitz slab (single K = 3*Wp*Cin matmul).
    w_slab = _build_toeplitz_conv_weight(w_conv, W).reshape(K3, W * Cout)
    w_slab = w_slab.astype(jnp.bfloat16)
    b_conv_wide = jnp.tile(b_conv.astype(jnp.float32), W).reshape(1, W * Cout)

    # Pool + classifier folded: logits = colsum @ w_fc_big + b_fc  (bf16 weight).
    w_fc_big = jnp.tile(jnp.transpose(w_fc, (1, 0)), (W, 1)) / float(HW)
    w_fc_big = jnp.pad(w_fc_big, ((0, 0), (0, NCP - NC))).astype(jnp.bfloat16)
    b_fc_pad = jnp.pad(b_fc, (0, NCP - NC)).reshape(1, NCP).astype(jnp.float32)

    out = pl.pallas_call(
        _conv_gap_fc_kernel,
        out_shape=jax.ShapeDtypeStruct((nblocks, G, NCP), jnp.float32),
        grid_spec=pltpu.PrefetchScalarGridSpec(
            num_scalar_prefetch=0,
            grid=(nblocks,),
            in_specs=[
                pl.BlockSpec((1, G * H, K3), lambda i: (i, 0, 0)),
                pl.BlockSpec((K3, W * Cout), lambda i: (0, 0)),
                pl.BlockSpec((1, W * Cout), lambda i: (0, 0)),
                pl.BlockSpec((W * Cout, NCP), lambda i: (0, 0)),
                pl.BlockSpec((1, NCP), lambda i: (0, 0)),
            ],
            out_specs=pl.BlockSpec((1, G, NCP), lambda i: (i, 0, 0)),
        ),
        compiler_params=pltpu.CompilerParams(
            dimension_semantics=("parallel",)),
    )(x_rows, w_slab, b_conv_wide, w_fc_big, b_fc_pad)

    return out.reshape(B_pad, NCP)[:B, :NC]


def _reference_forward(x_nchw, params):
    """Pure-JAX reference (lax conv) for correctness checking."""
    w_conv, b_conv, w_fc, b_fc = params
    y = jax.lax.conv_general_dilated(
        x_nchw.astype(jnp.float32), w_conv,
        window_strides=(1, 1), padding="SAME",
        dimension_numbers=("NCHW", "OIHW", "NCHW"))
    y = y + b_conv[None, :, None, None]
    y = jnp.maximum(y, 0.0)
    pooled = jnp.mean(y, axis=(2, 3))                          # (B, Cout)
    return pooled @ w_fc.T + b_fc[None, :]


def make_params(key, cin, cout, num_classes):
    k1, k2, k3, k4 = jax.random.split(key, 4)
    w_conv = jax.random.normal(k1, (cout, cin, 3, 3), jnp.float32) * 0.1
    b_conv = jax.random.normal(k2, (cout,), jnp.float32) * 0.1
    w_fc = jax.random.normal(k3, (num_classes, cout), jnp.float32) * 0.1
    b_fc = jax.random.normal(k4, (num_classes,), jnp.float32) * 0.1
    return (w_conv, b_conv, w_fc, b_fc)


if __name__ == "__main__":
    key = jax.random.PRNGKey(0)
    kx, kp = jax.random.split(key)

    B, Cin, H, W = 2, 4, 16, 16
    Cout, NC = 32, 10

    x = jax.random.normal(kx, (B, Cin, H, W), jnp.float32)     # NCHW like PyTorch
    params = make_params(kp, Cin, Cout, NC)

    logits = jax.jit(model_forward)(x, params)
    logits = jax.block_until_ready(logits)

    ref = _reference_forward(x, params)
    assert logits.shape == (B, NC)
    # bf16 MXU operands (conv input/weights, FC weights/colsum) with f32
    # accumulation -> loose tolerance vs the f32 reference.
    assert jnp.allclose(logits, ref, atol=3e-2, rtol=3e-2), "mismatch vs reference"

    print("KERNEL_OK")
</pallas_src>

<mosaic_0001>
module attributes {stable_mosaic.version = 11 : i64} {
  func.func @_conv_gap_fc_kernel(%arg0: i32, %arg1: memref<1x16x216xbf16, #tpu.memory_space<vmem>>, %arg2: memref<216x512xbf16, #tpu.memory_space<vmem>>, %arg3: memref<1x512xf32, #tpu.memory_space<vmem>>, %arg4: memref<512x128xbf16, #tpu.memory_space<vmem>>, %arg5: memref<1x128xf32, #tpu.memory_space<vmem>>, %arg6: memref<1x1x128xf32, #tpu.memory_space<vmem>>) attributes {dimension_semantics = [#tpu.dimension_semantics<parallel>], iteration_bounds = array<i64: 2>, scalar_prefetch = 0 : i64, scratch_operands = 0 : i64, tpu.core_type = #tpu.core_type<tc>, window_params = [{transform_indices = @transform_0, window_bounds = array<i64: 1, 16, 216>}, {pipeline_mode = #tpu.pipeline_mode<synchronous>, transform_indices = @transform_1, window_bounds = array<i64: 216, 512>}, {pipeline_mode = #tpu.pipeline_mode<synchronous>, transform_indices = @transform_2, window_bounds = array<i64: 1, 512>}, {pipeline_mode = #tpu.pipeline_mode<synchronous>, transform_indices = @transform_3, window_bounds = array<i64: 512, 128>}, {pipeline_mode = #tpu.pipeline_mode<synchronous>, transform_indices = @transform_4, window_bounds = array<i64: 1, 128>}, {transform_indices = @transform_5, window_bounds = array<i64: 1, 1, 128>}]} {
    %c0 = arith.constant 0 : index
    %c0_0 = arith.constant 0 : index
    %c0_1 = arith.constant 0 : index
    %0 = vector.load %arg1[%c0, %c0_0, %c0_1] : memref<1x16x216xbf16, #tpu.memory_space<vmem>>, vector<1x16x216xbf16>
    %1 = vector.shape_cast %0 : vector<1x16x216xbf16> to vector<16x216xbf16>
    %c0_2 = arith.constant 0 : index
    %c0_3 = arith.constant 0 : index
    %2 = vector.load %arg2[%c0_2, %c0_3] : memref<216x512xbf16, #tpu.memory_space<vmem>>, vector<216x512xbf16>
    %cst = arith.constant dense<0.000000e+00> : vector<16x512xf32>
    %3 = tpu.matmul %1, %2, %cst {dimension_numbers = #tpu.dot_dimension_numbers<[1], [0], [0], [1], [0, 0, 1, 1], [], []>} : vector<16x216xbf16>, vector<216x512xbf16>, vector<16x512xf32> -> vector<16x512xf32>
    %c0_4 = arith.constant 0 : index
    %c0_5 = arith.constant 0 : index
    %4 = vector.load %arg3[%c0_4, %c0_5] : memref<1x512xf32, #tpu.memory_space<vmem>>, vector<1x512xf32>
    %5 = vector.broadcast %4 : vector<1x512xf32> to vector<16x512xf32>
    %6 = arith.addf %3, %5 : vector<16x512xf32>
    %cst_6 = arith.constant 0.000000e+00 : f32
    %7 = vector.broadcast %cst_6 : f32 to vector<16x512xf32>
    %8 = arith.maximumf %6, %7 : vector<16x512xf32>
    %9 = vector.shape_cast %8 : vector<16x512xf32> to vector<1x16x512xf32>
    %cst_7 = arith.constant dense<0.000000e+00> : vector<1x512xf32>
    %10 = vector.multi_reduction <add>, %9, %cst_7 [1] : vector<1x16x512xf32> to vector<1x512xf32>
    %11 = arith.truncf %10 : vector<1x512xf32> to vector<1x512xbf16>
    %c0_8 = arith.constant 0 : index
    %c0_9 = arith.constant 0 : index
    %12 = vector.load %arg4[%c0_8, %c0_9] : memref<512x128xbf16, #tpu.memory_space<vmem>>, vector<512x128xbf16>
    %cst_10 = arith.constant dense<0.000000e+00> : vector<1x128xf32>
    %13 = tpu.matmul %11, %12, %cst_10 {dimension_numbers = #tpu.dot_dimension_numbers<[1], [0], [0], [1], [0, 0, 1, 1], [], []>} : vector<1x512xbf16>, vector<512x128xbf16>, vector<1x128xf32> -> vector<1x128xf32>
    %c0_11 = arith.constant 0 : index
    %c0_12 = arith.constant 0 : index
    %14 = vector.load %arg5[%c0_11, %c0_12] : memref<1x128xf32, #tpu.memory_space<vmem>>, vector<1x128xf32>
    %15 = arith.addf %13, %14 : vector<1x128xf32>
    %16 = vector.shape_cast %15 : vector<1x128xf32> to vector<1x1x128xf32>
    %c0_13 = arith.constant 0 : index
    %c0_14 = arith.constant 0 : index
    %c0_15 = arith.constant 0 : index
    %17 = vector.load %arg6[%c0_13, %c0_14, %c0_15] : memref<1x1x128xf32, #tpu.memory_space<vmem>>, vector<1x1x128xf32>
    tpu.vector_store %arg6[%c0_13, %c0_14, %c0_15], %16 {strides = array<i32>} : memref<1x1x128xf32, #tpu.memory_space<vmem>>, vector<1x1x128xf32>,
    return
  }
  func.func @transform_0(%arg0: i32) -> (i32, i32, i32) {
    %c0_i32 = arith.constant 0 : i32
    %c0_i32_0 = arith.constant 0 : i32
    %c0_i32_1 = arith.constant 0 : i32
    return %arg0, %c0_i32, %c0_i32_0 : i32, i32, i32
  }
  func.func @transform_1(%arg0: i32) -> (i32, i32) {
    %c0_i32 = arith.constant 0 : i32
    %c0_i32_0 = arith.constant 0 : i32
    %c0_i32_1 = arith.constant 0 : i32
    return %c0_i32, %c0_i32_0 : i32, i32
  }
  func.func @transform_2(%arg0: i32) -> (i32, i32) {
    %c0_i32 = arith.constant 0 : i32
    %c0_i32_0 = arith.constant 0 : i32
    %c0_i32_1 = arith.constant 0 : i32
    return %c0_i32, %c0_i32_0 : i32, i32
  }
  func.func @transform_3(%arg0: i32) -> (i32, i32) {
    %c0_i32 = arith.constant 0 : i32
    %c0_i32_0 = arith.constant 0 : i32
    %c0_i32_1 = arith.constant 0 : i32
    return %c0_i32, %c0_i32_0 : i32, i32
  }
  func.func @transform_4(%arg0: i32) -> (i32, i32) {
    %c0_i32 = arith.constant 0 : i32
    %c0_i32_0 = arith.constant 0 : i32
    %c0_i32_1 = arith.constant 0 : i32
    return %c0_i32, %c0_i32_0 : i32, i32
  }
  func.func @transform_5(%arg0: i32) -> (i32, i32, i32) {
    %c0_i32 = arith.constant 0 : i32
    %c0_i32_0 = arith.constant 0 : i32
    %c0_i32_1 = arith.constant 0 : i32
    return %arg0, %c0_i32, %c0_i32_0 : i32, i32, i32
  }
}

</mosaic_0001>

<bundles_post_ra>
// kernel: tile.13
= control target key start
LH: loop header
LB: loop body
LE: loop exit
PB: predicated region body
PF: predicated region fallthrough
CT: control target
= control target key end

     0   :  { %s28_s0 = inlined_call_operand.vmem [shape: f32[32], index: 0, kind: input, shape index: {}]   ;;  %s29_s1 = inlined_call_operand.vmem [shape: f32[16,32], index: 1, kind: output, shape index: {}]  }
   0x1   :  { %v4_v0 = vld [vmem:[%s28_s0] ss:$0 sm:$0xff] }
   0x2   :  { %5 = vst [vmem:[%s29_s1] sm:$0xff] %v4_v0  ;;  %8 = vst [vmem:[%s29_s1 + $0x8] sm:$0xff] %v4_v0 }

// kernel: tile.14
= control target key start
LH: loop header
LB: loop body
LE: loop exit
PB: predicated region body
PF: predicated region fallthrough
CT: control target
= control target key end

     0   :  { %s57_s8 = smov 96   ;;  %vm3_vm0 = vcmask 261120   ;;  %s59_s15 = smov 64   ;;  %vm9_vm1 = vcmask 1048320   ;;  %vm15_vm2 = vcmask 785920   ;;  %vm21_vm3 = vcmask 523520   ;;  %s94_s0 = inlined_call_operand.vmem [shape: f32[16,32], index: 0, kind: input, shape index: {}]   ;;  %s95_s1 = inlined_call_operand.vmem [shape: f32[1,512], index: 1, kind: output, shape index: {}]  }
   0x1   :  { %v48_v0 = vld [vmem:[%s94_s0 + $0x3] ss:$4 sm:$0xf]   ;;  %v49_v1 = vld [vmem:[%s94_s0 + $0x2] ss:$4 sm:$0xf]  }
   0x2   :  { %7 = vrot.lane.b32.xlu0 %v48_v0, %s57_s8  ;;  %v50_v2 = vld [vmem:[%s94_s0 + $0x1] ss:$4 sm:$0xf]   ;;  %v2_v3 = vld [vmem:[%s94_s0] ss:$4 sm:$0xf]  }
   0x3   :  { %s58_s0 = smov 32   ;;  %4 = vst.msk [vmem:[#allocation0] ss:$8 sm:$0xf] %vm3_vm0, %v2_v3  }
   0x4   :  { %19 = vrot.lane.b32.xlu1 %v50_v2, %s58_s0 }
   0x6   :  { %13 = vrot.lane.b32.xlu0 %v49_v1, %s59_s15 }
  0x74   :  { %v8_v4 = vpop.permute.xlu0 %7  }
  0x75   :  { %10 = vst.msk [vmem:[#allocation0] ss:$8 sm:$0xf] %vm9_vm1, %v8_v4  }
  0x76   :  { %v20_v5 = vpop.permute.xlu1 %19  }
  0x78   :  { %v14_v6 = vpop.permute.xlu0 %13  }
  0x79   :  { %16 = vst.msk [vmem:[#allocation0] ss:$8 sm:$0xf] %vm15_vm2, %v14_v6  }
  0x7a   :  { %22 = vst.msk [vmem:[#allocation0] ss:$8 sm:$0xf] %vm21_vm3, %v20_v5  }
  0x81   :  { %v26_v7 = vld [vmem:[#allocation0] sm:$0x1]  ;;  %v30_v8 = vld [vmem:[#allocation0 + $0x8] sm:$0x1]  ;;  %v35_v9 = vld [vmem:[#allocation0 + $0x10] sm:$0x1] }
  0x82   :  { %28 = vst [vmem:[%s95_s1] sm:$0x1] %v26_v7  ;;  %51 = vst [vmem:[%s95_s1 + $0x1] sm:$0x1] %v30_v8  ;;  %v41_v10 = vld [vmem:[#allocation0 + $0x18] sm:$0x1] }
  0x83   :  { %52 = vst [vmem:[%s95_s1 + $0x2] sm:$0x1] %v35_v9  ;;  %53 = vst [vmem:[%s95_s1 + $0x3] sm:$0x1] %v41_v10 }

// kernel: model_forward.1
= control target key start
LH: loop header
LB: loop body
LE: loop exit
PB: predicated region body
PF: predicated region fallthrough
CT: control target
= control target key end

     0   :  { %10 = vsyncpa [#allocation3], 0  ;;  %s1900_s0 = inlined_call_operand.vmem [shape: bf16[2,16,216], index: 0, kind: input, shape index: {}]   ;;  %s1901_s1 = inlined_call_operand.vmem [shape: bf16[216,512], index: 1, kind: input, shape index: {}]   ;;  %s1902_s2 = inlined_call_operand.vmem [shape: f32[1,512], index: 2, kind: input, shape index: {}]   ;;  %s1903_s3 = inlined_call_operand.vmem [shape: bf16[512,128], index: 3, kind: input, shape index: {}]   ;;  %s1904_s4 = inlined_call_operand.vmem [shape: f32[1,128], index: 4, kind: input, shape index: {}]   ;;  %s1905_s5 = inlined_call_operand.hbm [shape: f32[2,1,128], index: 5, kind: output, shape index: {}]  }
   0x1   :  { %12 = vsyncpa [#allocation3 + $0x1], 0  ;;  %s1528_s18 = smov 0   ;;  %s1530_s19 = smov 0  }
   0x2   :  { %s1532_s20 = smov 0   ;;  %s1534_s21 = smov 0  }
   0x3 LB: > { %s1549_s22 = sadd.s32 4294967295, %s1495_s21   ;;  %s1129_s23 = sadd.s32 4294967294, %s1495_s21   ;;  %s1495_s21 = sphi %s1534_s21, %s1911_s21   ;;  %s1491_s20 = sphi %s1532_s20, %s1910_s20   ;;  %s1487_s19 = sphi %s1530_s19, %s1909_s19   ;;  %s1483_s18 = sphi %s1528_s18, %s1908_s18  }
   0x4   : > { %s1553_s24 = sadd.s32 1, %s1495_s21   ;;  %s135_s25 = sadd.s32 1, %s1491_s20 }
   0x5   : > { %s132_s26 = ssub.s32 %s1495_s21, %s1553_s24  ;;  %p145_p0 = scmp.ne.s32.totalorder %s1491_s20, %s1487_s19 }
   0x6   : > { %p133_p1 = scmp.eq.s32.totalorder %s132_s26, 0  ;;  %p146_p2 = scmp.eq.s32.totalorder %s1549_s22, 1 }
   0x7   : > { %p151_p3 = scmp.ne.s32.totalorder %s1487_s19, %s1483_s18  ;;  %p152_p4 = scmp.eq.s32.totalorder %s1129_s23, 1 }
   0x8   : > { %s1564_s27 = scalar_select %p133_p1, %s1491_s20, %s135_s25  }
   0x9   : > { %p1566_p5 = por %p146_p2, %p145_p0  ;;  %p1570_p6 = por %p152_p4, %p151_p3 }
   0xa   : > { %p1132_p7 = scmp.ge.s32.totalorder %s1495_s21, 1  ;;  %p190_p8 = scmp.lt.s32.totalorder %s1495_s21, 3 }
   0xc   : > { %p191_p9 = pnand %p1132_p7, %p190_p8 }
   0xd   : > { %v1316_v0 = vld [vmem:[%s1901_s1 + $0x4] ss:$16 sps:$4 sm:$0xff] (!%p191_p9)   ;;  %v1318_v1 = vld [vmem:[%s1901_s1 + $0xc] ss:$16 sps:$4 sm:$0xff] (!%p191_p9)   ;;  %v1320_v2 = vld [vmem:[%s1901_s1] ss:$16 sps:$4 sm:$0xff] (!%p191_p9)  }
   0xe   : > { %194 = sbr.rel (%p191_p9) target bundleno = 539 (0x21b), region = 40  ;;  %597 = vmatprep.subr.bf16.mxu0 (!%p191_p9), %v1316_v0  ;;  %v1321_v3 = vld [vmem:[%s1901_s1 + $0x8] ss:$16 sps:$4 sm:$0xff] (!%p191_p9)   ;;  %640 = vmatprep.subr.bf16.mxu1 (!%p191_p9), %v1318_v1  ;;  %v1322_v4 = vld [vmem:[%s1901_s1 + $0x24] ss:$16 sps:$4 sm:$0xff] (!%p191_p9)   ;;  %p217_p10 = scmp.lt.s32.totalorder (!%p191_p9), %s1549_s22, 1 }
   0xf   : > { %598 = vmatpush1.bf16.msra.mxu0 (!%p191_p9), %v1320_v2  ;;  %641 = vmatpush1.bf16.msra.mxu1 (!%p191_p9), %v1321_v3  ;;  %v1324_v5 = vld [vmem:[%s1901_s1 + $0x2c] ss:$16 sps:$4 sm:$0xff] (!%p191_p9)   ;;  %v1326_v6 = vld [vmem:[%s1901_s1 + $0x20] ss:$16 sps:$4 sm:$0xff] (!%p191_p9)   ;;  %v1327_v7 = vld [vmem:[%s1901_s1 + $0x28] ss:$16 sps:$4 sm:$0xff] (!%p191_p9)  }
  0x10   : > { %599 = vmatprep.subr.bf16.mxu0 (!%p191_p9), %v1322_v4  ;;  %642 = vmatprep.subr.bf16.mxu1 (!%p191_p9), %v1324_v5  ;;  %v1328_v8 = vld [vmem:[%s1901_s1 + $0x44] ss:$16 sps:$4 sm:$0xff] (!%p191_p9)   ;;  %v1330_v9 = vld [vmem:[%s1901_s1 + $0x4c] ss:$16 sps:$4 sm:$0xff] (!%p191_p9)   ;;  %v1332_v10 = vld [vmem:[%s1901_s1 + $0x40] ss:$16 sps:$4 sm:$0xff] (!%p191_p9)  }
  0x11   : > { %v1333_v11 = vld [vmem:[%s1901_s1 + $0x48] ss:$16 sps:$4 sm:$0xff] (!%p191_p9)   ;;  %v1334_v12 = vld [vmem:[%s1901_s1 + $0x64] ss:$16 sps:$4 sm:$0xff] (!%p191_p9)   ;;  %v1336_v13 = vld [vmem:[%s1901_s1 + $0x6c] ss:$16 sps:$4 sm:$0xff] (!%p191_p9)  }
  0x12   : > { %v1338_v14 = vld [vmem:[%s1901_s1 + $0x60] ss:$16 sps:$4 sm:$0xff] (!%p191_p9)   ;;  %v1339_v15 = vld [vmem:[%s1901_s1 + $0x68] ss:$16 sps:$4 sm:$0xff] (!%p191_p9)   ;;  %v1340_v16 = vld [vmem:[%s1901_s1 + $0x84] ss:$16 sps:$4 sm:$0xff] (!%p191_p9)  }
  0x13   : > { %600 = vmatpush1.bf16.msra.mxu0 (!%p191_p9), %v1326_v6  ;;  %643 = vmatpush1.bf16.msra.mxu1 (!%p191_p9), %v1327_v7  ;;  %v1342_v17 = vld [vmem:[%s1901_s1 + $0x8c] ss:$16 sps:$4 sm:$0xff] (!%p191_p9)   ;;  %v1344_v18 = vld [vmem:[%s1901_s1 + $0x80] ss:$16 sps:$4 sm:$0xff] (!%p191_p9)   ;;  %v1345_v19 = vld [vmem:[%s1901_s1 + $0x88] ss:$16 sps:$4 sm:$0xff] (!%p191_p9)  }
  0x14   : > { %601 = vmatprep.subr.bf16.mxu0 (!%p191_p9), %v1328_v8  ;;  %644 = vmatprep.subr.bf16.mxu1 (!%p191_p9), %v1330_v9  ;;  %v1346_v20 = vld [vmem:[%s1901_s1 + $0xa4] ss:$16 sps:$4 sm:$0xff] (!%p191_p9)   ;;  %v1348_v21 = vld [vmem:[%s1901_s1 + $0xac] ss:$16 sps:$4 sm:$0xff] (!%p191_p9)   ;;  %v1350_v22 = vld [vmem:[%s1901_s1 + $0xa0] ss:$16 sps:$4 sm:$0xff] (!%p191_p9)  }
  0x15   : > { %v1351_v23 = vld [vmem:[%s1901_s1 + $0xa8] ss:$16 sps:$4 sm:$0xff]   ;;  %v1352_v24 = vld [vmem:[%s1901_s1 + $0xc4] ss:$16 sps:$4 sm:$0xff]   ;;  %v1354_v25 = vld [vmem:[%s1901_s1 + $0xcc] ss:$16 sps:$4 sm:$0xff]  }
  0x16   : > { %v1356_v26 = vld [vmem:[%s1901_s1 + $0xc0] ss:$16 sps:$4 sm:$0xff]   ;;  %v1357_v27 = vld [vmem:[%s1901_s1 + $0xc8] ss:$16 sps:$4 sm:$0xff]   ;;  %v1358_v28 = vld [vmem:[%s1901_s1 + $0xe4] ss:$16 sps:$4 sm:$0xff]  }
  0x17   : > { %602 = vmatpush1.bf16.msra.mxu0 %v1332_v10  ;;  %645 = vmatpush1.bf16.msra.mxu1 %v1333_v11  ;;  %v1360_v29 = vld [vmem:[%s1901_s1 + $0xec] ss:$16 sps:$4 sm:$0xff]   ;;  %s218_s17 = scalar_select %p217_p10, %s1549_s22, 1  ;;  %v1362_v30 = vld [vmem:[%s1901_s1 + $0xe0] ss:$16 sps:$4 sm:$0xff]   ;;  %vm580_vm0 = vcmask 719872  }
  0x18   : > { %603 = vmatprep.subr.bf16.mxu0 %v1334_v12  ;;  %646 = vmatprep.subr.bf16.mxu1 %v1336_v13  ;;  %v1363_v31 = vld [vmem:[%s1901_s1 + $0xe8] ss:$16 sps:$4 sm:$0xff]   ;;  %v1364_v32 = vld [vmem:[%s1901_s1 + $0x104] ss:$16 sps:$4 sm:$0xff]   ;;  %v1366_v33 = vld [vmem:[%s1901_s1 + $0x10c] ss:$16 sps:$4 sm:$0xff]  }
  0x19   : > { %s1232_s10 = sshll.u32 %s218_s17, 4  ;;  %v1368_v34 = vld [vmem:[%s1901_s1 + $0x100] ss:$16 sps:$4 sm:$0xff]   ;;  %v1369_v35 = vld [vmem:[%s1901_s1 + $0x108] ss:$16 sps:$4 sm:$0xff]   ;;  %vm584_vm1 = vcmask 1043456  }
  0x1a   : > { %v1370_v36 = vld [vmem:[%s1901_s1 + $0x124] ss:$16 sps:$4 sm:$0xff]   ;;  %v1372_v37 = vld [vmem:[%s1901_s1 + $0x12c] ss:$16 sps:$4 sm:$0xff]   ;;  %s1695_s30 = scalar_lea.vmem %s1900_s0, %s1232_s10  ;;  %v1374_v38 = vld [vmem:[%s1901_s1 + $0x120] ss:$16 sps:$4 sm:$0xff]  }
  0x1b   : > { %604 = vmatpush1.bf16.msra.mxu0 %v1338_v14  ;;  %647 = vmatpush1.bf16.msra.mxu1 %v1339_v15  ;;  %v1375_v39 = vld [vmem:[%s1901_s1 + $0x128] ss:$16 sps:$4 sm:$0xff]   ;;  %v1376_v40 = vld [vmem:[%s1901_s1 + $0x144] ss:$16 sps:$4 sm:$0xff]   ;;  %v1378_v41 = vld [vmem:[%s1901_s1 + $0x14c] ss:$16 sps:$4 sm:$0xff]  }
  0x1c   : > { %605 = vmatprep.subr.bf16.mxu0 %v1340_v16  ;;  %648 = vmatprep.subr.bf16.mxu1 %v1342_v17  ;;  %v277_v42 = vld [vmem:[%s1901_s1 + $0x1a0] sm:$0xff]  ;;  %v278_v44 = vld [vmem:[%s1901_s1 + $0x1a8] sm:$0xff]  ;;  %v1409_v6 = vld [vmem:[%s1903_s3 + $0x50] sm:$0xff]   ;;  %s215_s11 = sand.u32 1, %s1487_s19   ;;  %s1229_s14 = sshll.u32 %s1549_s22, 4 }
  0x1d   : > { %v1400_v43 = vld [vmem:[%s1695_s30 + $0x4] ss:$8 sps:$4 sm:$0xff]   ;;  %v1380_v45 = vld [vmem:[%s1901_s1 + $0x140] ss:$16 sps:$4 sm:$0xff]   ;;  %v1381_v46 = vld [vmem:[%s1901_s1 + $0x148] ss:$16 sps:$4 sm:$0xff]   ;;  %v1189_v48 = vcombine.low %v277_v42, %v277_v42  ;;  %v1191_v49 = vcombine.low %v278_v44, %v278_v44  ;;  %v1190_v59 = vcombine.high %v277_v42, %v277_v42  ;;  %v1192_v60 = vcombine.high %v278_v44, %v278_v44  ;;  %s1858_s25 = scalar_lea.hbm %s1905_s5, %s1229_s14 }
  0x1e   : > { %1194 = vmatprep.mubr.msk.bf16.mxu0 %vm580_vm0, %v1400_v43  ;;  %1196 = vmatprep.mubr.msk.bf16.mxu1 %vm580_vm0, %v1400_v43  ;;  %v1382_v47 = vld [vmem:[%s1901_s1 + $0x164] ss:$16 sps:$4 sm:$0xff]   ;;  %v1384_v50 = vld [vmem:[%s1901_s1 + $0x16c] ss:$16 sps:$4 sm:$0xff]   ;;  %v1386_v51 = vld [vmem:[%s1901_s1 + $0x160] ss:$16 sps:$4 sm:$0xff]  }
  0x1f   : > { %606 = vmatpush1.bf16.msra.mxu0 %v1344_v18  ;;  %649 = vmatpush1.bf16.msra.mxu1 %v1345_v19  ;;  %v1387_v52 = vld [vmem:[%s1901_s1 + $0x168] ss:$16 sps:$4 sm:$0xff]   ;;  %v1388_v53 = vld [vmem:[%s1901_s1 + $0x184] ss:$16 sps:$4 sm:$0xff]   ;;  %v1390_v54 = vld [vmem:[%s1901_s1 + $0x18c] ss:$16 sps:$4 sm:$0xff]  }
  0x20   : > { %607 = vmatprep.subr.bf16.mxu0 %v1346_v20  ;;  %650 = vmatprep.subr.bf16.mxu1 %v1348_v21  ;;  %v586_v55 = vsel %vm584_vm1, %v1189_v48, 0  ;;  %v592_v56 = vsel %vm584_vm1, %v1191_v49, 0  ;;  %v1392_v57 = vld [vmem:[%s1901_s1 + $0x180] ss:$16 sps:$4 sm:$0xff]   ;;  %v1393_v58 = vld [vmem:[%s1901_s1 + $0x188] ss:$16 sps:$4 sm:$0xff]  }
  0x21   : > { %v1401_v61 = vld [vmem:[%s1903_s3 + $0x40] sm:$0xff]   ;;  %v1405_v2 = vld [vmem:[%s1903_s3 + $0x48] sm:$0xff]   ;;  %v1410_v7 = vld [vmem:[%s1903_s3 + $0xd0] sm:$0xff]   ;;  %s216_s10 = scalar_lea.vmem [#allocation2], %s215_s11  ;;  %s1062_s17 = scalar_lea.sflag [#allocation3], %s215_s11 }
  0x22   : > { %v1402_v62 = vld [vmem:[%s1903_s3 + $0xc0] sm:$0xff]   ;;  %v1406_v3 = vld [vmem:[%s1903_s3 + $0xc8] sm:$0xff]   ;;  %v1411_v8 = vld [vmem:[%s1903_s3 + $0x10] sm:$0xff]   ;;  %s1074_s15 = sshll.u32 %s216_s10, 4  ;;  %s1497_s22 = smov [#allocation2]   ;;  %s1860_s15 = int_to_ptr.vmem [resolvable:$true] %s1074_s15 }
  0x23   : > { %608 = vmatpush1.bf16.msra.mxu0 %v1350_v22  ;;  %651 = vmatpush1.bf16.msra.mxu1 %v1351_v23  ;;  %v1398_v63 = vld [vmem:[%s1695_s30] ss:$8 sps:$4 sm:$0xff]   ;;  %v1412_v9 = vld [vmem:[%s1903_s3 + $0x90] sm:$0xff]   ;;  %v1413_v10 = vld [vmem:[%s1903_s3 + $0x58] sm:$0xff]   ;;  %s1433_s30 = scalar_lea.vmem %s1860_s15, 16  ;;  %s1437_s26 = sshll.u32 %s1497_s22, 4  ;;  %s1438_s26 = int_to_ptr.vmem [resolvable:$false] %s1437_s26 }
  0x24   : > { %609 = vmatprep.subr.bf16.mxu0 %v1352_v24  ;;  %652 = vmatprep.subr.bf16.mxu1 %v1354_v25  ;;  %v1403_v0 = vld [vmem:[%s1903_s3] sm:$0xff]   ;;  %v1407_v4 = vld [vmem:[%s1903_s3 + $0x8] sm:$0xff]   ;;  %v1414_v11 = vld [vmem:[%s1903_s3 + $0xd8] sm:$0xff]   ;;  %p1434_p11 = scmp.ne.s32.totalorder %s1860_s15, %s1433_s30  ;;  %s1439_s6 = scalar_lea.vmem %s1438_s26, 32 }
  0x25   : > { %v1404_v1 = vld [vmem:[%s1903_s3 + $0x80] sm:$0xff]   ;;  %v1408_v5 = vld [vmem:[%s1903_s3 + $0x88] sm:$0xff]   ;;  %v1415_v12 = vld [vmem:[%s1903_s3 + $0x18] sm:$0xff]   ;;  %p1440_p0 = scmp.lt.s32.totalorder %s1860_s15, %s1438_s26  ;;  %p1441_p1 = scmp.lt.s32.totalorder %s1439_s6, %s1433_s30 }
  0x26   : > { %v1416_v13 = vld [vmem:[%s1903_s3 + $0x98] sm:$0xff]   ;;  %v1417_v14 = vld [vmem:[%s1903_s3 + $0x60] sm:$0xff]   ;;  %v1421_v18 = vld [vmem:[%s1903_s3 + $0x68] sm:$0xff]   ;;  %p1435_p12 = pnand %p1434_p11, %p1566_p5 }
  0x27   : > { %610 = vmatpush1.bf16.msra.mxu0 %v1356_v26  ;;  %653 = vmatpush1.bf16.msra.mxu1 %v1357_v27  ;;  %v1418_v15 = vld [vmem:[%s1903_s3 + $0xe0] sm:$0xff]   ;;  %v1422_v19 = vld [vmem:[%s1903_s3 + $0xe8] sm:$0xff]   ;;  %v1425_v22 = vld [vmem:[%s1903_s3 + $0x70] sm:$0xff]   ;;  %p1442_p2 = por %p1441_p1, %p1440_p0 }
  0x28   : > { %611 = vmatprep.subr.bf16.mxu0 %v1358_v28  ;;  %654 = vmatprep.subr.bf16.mxu1 %v1360_v29  ;;  %v1419_v16 = vld [vmem:[%s1903_s3 + $0x20] sm:$0xff]   ;;  %v1423_v20 = vld [vmem:[%s1903_s3 + $0x28] sm:$0xff]   ;;  %v1426_v23 = vld [vmem:[%s1903_s3 + $0xf0] sm:$0xff]   ;;  %p1436_p13 = pneg %p1435_p12 }
  0x29   : > { %v1420_v17 = vld [vmem:[%s1903_s3 + $0xa0] sm:$0xff]   ;;  %v1424_v21 = vld [vmem:[%s1903_s3 + $0xa8] sm:$0xff]   ;;  %v1427_v24 = vld [vmem:[%s1903_s3 + $0x30] sm:$0xff]  }
  0x2a   : > { %v1428_v25 = vld [vmem:[%s1903_s3 + $0xb0] sm:$0xff]   ;;  %v1429_v26 = vld [vmem:[%s1903_s3 + $0x78] sm:$0xff]   ;;  %p1443_p3 = pnand %p1442_p2, %p1436_p13 }
  0x2b   : > { %612 = vmatpush1.bf16.msra.mxu0 %v1362_v30  ;;  %655 = vmatpush1.bf16.msra.mxu1 %v1363_v31  ;;  %v1430_v27 = vld [vmem:[%s1903_s3 + $0xf8] sm:$0xff]   ;;  %v281_v30 = vlaneseq }
  0x2c   : > { %613 = vmatprep.subr.bf16.mxu0 %v1364_v32  ;;  %656 = vmatprep.subr.bf16.mxu1 %v1366_v33  ;;  %v1431_v28 = vld [vmem:[%s1903_s3 + $0x38] sm:$0xff]  }
  0x2d   : > { %v1432_v29 = vld [vmem:[%s1903_s3 + $0xb8] sm:$0xff]   ;;  %v282_v31 = vshrl.u32 %v281_v30, 7 }
  0x2f   : > { %614 = vmatpush1.bf16.msra.mxu0 %v1368_v34  ;;  %657 = vmatpush1.bf16.msra.mxu1 %v1369_v35  ;;  %v283_v32 = vsub.s32 0, %v282_v31  ;;  %v291_v33 = vsub.s32 2, %v282_v31  ;;  %v279_v34 = vld [vmem:[%s1902_s2] sm:$0xf]  ;;  %v287_v35 = vsub.s32 1, %v282_v31 }
  0x30   : > { %615 = vmatprep.subr.bf16.mxu0 %v1370_v36  ;;  %658 = vmatprep.subr.bf16.mxu1 %v1372_v37  ;;  %v295_v36 = vsub.s32 3, %v282_v31 }
  0x31   : > { %v284_v37 = vrot.slane %v279_v34, %v283_v32 }
  0x33   : > { %616 = vmatpush1.bf16.msra.mxu0 %v1374_v38  ;;  %659 = vmatpush1.bf16.msra.mxu1 %v1375_v39  ;;  %v292_v38 = vrot.slane %v279_v34, %v291_v33  ;;  %v288_v39 = vrot.slane %v279_v34, %v287_v35  ;;  %v787_v35 = vld [vmem:[%s1904_s4] sm:$0x1] }
  0x34   : > { %617 = vmatprep.subr.bf16.mxu0 %v1376_v40  ;;  %660 = vmatprep.subr.bf16.mxu1 %v1378_v41  ;;  %v296_v40 = vrot.slane %v279_v34, %v295_v36 }
  0x37   : > { %618 = vmatpush1.bf16.msra.mxu0 %v1380_v45  ;;  %661 = vmatpush1.bf16.msra.mxu1 %v1381_v46 }
  0x38   : > { %619 = vmatprep.subr.bf16.mxu0 %v1382_v47  ;;  %662 = vmatprep.subr.bf16.mxu1 %v1384_v50 }
  0x3b   : > { %620 = vmatpush1.bf16.msra.mxu0 %v1386_v51  ;;  %663 = vmatpush1.bf16.msra.mxu1 %v1387_v52 }
  0x3c   : > { %621 = vmatprep.subr.bf16.mxu0 %v1388_v53  ;;  %664 = vmatprep.subr.bf16.mxu1 %v1390_v54 }
  0x3f   : > { %622 = vmatpush1.bf16.msra.mxu0 %v1392_v57  ;;  %665 = vmatpush1.bf16.msra.mxu1 %v1393_v58 }
  0x40   : > { %1193 = vmatprep.subr.msk.bf16.mxu0 %vm584_vm1, %v1190_v59  ;;  %1195 = vmatprep.subr.msk.bf16.mxu1 %vm584_vm1, %v1192_v60 }
  0x43   : > { %624 = vmatpush1.bf16.msra.mxu0 %v586_v55  ;;  %667 = vmatpush1.bf16.msra.mxu1 %v592_v56 }
  0x44   : > { %1233 = vmatprep.subr.bf16.mxu0 %v1401_v61  ;;  %1255 = vmatprep.subr.bf16.mxu1 %v1402_v62 }
  0x46   : > { %630 = vmatmul.mubr.bf16.vlgmr.msra.gmra.mrb[0].mxu0 %v1398_v63  ;;  %673 = vmatmul.mubr.bf16.vlgmr.msra.gmra.mrb[0].mxu1 %v1398_v63 }
  0x47   : > { %1234 = vmatpush3.bf16.msra.mxu0 %v1403_v0  ;;  %1256 = vmatpush3.bf16.msra.mxu1 %v1404_v1 }
  0x48   : > { %1235 = vmatprep.subr.bf16.mxu0 %v1405_v2  ;;  %1257 = vmatprep.subr.bf16.mxu1 %v1406_v3 }
  0x4b   : > { %1236 = vmatpush3.bf16.msra.mxu0 %v1407_v4  ;;  %1258 = vmatpush3.bf16.msra.mxu1 %v1408_v5 }
  0x4c   : > { %1237 = vmatprep.subr.bf16.mxu0 %v1409_v6  ;;  %1259 = vmatprep.subr.bf16.mxu1 %v1410_v7 }
  0x4f   : > { %1238 = vmatpush3.bf16.msra.mxu0 %v1411_v8  ;;  %1260 = vmatpush3.bf16.msra.mxu1 %v1412_v9 }
  0x50   : > { %1239 = vmatprep.subr.bf16.mxu0 %v1413_v10  ;;  %1261 = vmatprep.subr.bf16.mxu1 %v1414_v11 }
  0x53   : > { %1240 = vmatpush3.bf16.msra.mxu0 %v1415_v12  ;;  %1262 = vmatpush3.bf16.msra.mxu1 %v1416_v13 }
  0x54   : > { %1241 = vmatprep.subr.bf16.mxu0 %v1417_v14  ;;  %1263 = vmatprep.subr.bf16.mxu1 %v1418_v15 }
  0x57   : > { %1242 = vmatpush3.bf16.msra.mxu0 %v1419_v16  ;;  %1264 = vmatpush3.bf16.msra.mxu1 %v1420_v17 }
  0x58   : > { %1243 = vmatprep.subr.bf16.mxu0 %v1421_v18  ;;  %1265 = vmatprep.subr.bf16.mxu1 %v1422_v19 }
  0x5b   : > { %1244 = vmatpush3.bf16.msra.mxu0 %v1423_v20  ;;  %1266 = vmatpush3.bf16.msra.mxu1 %v1424_v21 }
  0x5c   : > { %1245 = vmatprep.subr.bf16.mxu0 %v1425_v22  ;;  %1267 = vmatprep.subr.bf16.mxu1 %v1426_v23 }
  0x5f   : > { %1246 = vmatpush3.bf16.msra.mxu0 %v1427_v24  ;;  %1268 = vmatpush3.bf16.msra.mxu1 %v1428_v25 }
  0x60   : > { %1247 = vmatprep.subr.bf16.mxu0 %v1429_v26  ;;  %1269 = vmatprep.subr.bf16.mxu1 %v1430_v27 }
  0x63   : > { %1248 = vmatpush3.bf16.msra.mxu0 %v1431_v28  ;;  %1270 = vmatpush3.bf16.msra.mxu1 %v1432_v29 }
 0x119   : > { %v631_v41 = vpop.f32.mrb[0].mxu0  ;;  %v674_v42 = vpop.f32.mrb[0].mxu1 }
 0x11a   : > { %v632_v43 = vadd.f32 %v631_v41, %v284_v37  ;;  %v675_v44 = vadd.f32 %v674_v42, %v292_v38  ;;  %v633_v45 = vpop.f32.mrb[1].mxu0  ;;  %v676_v46 = vpop.f32.mrb[1].mxu1 }
 0x11b   : > { %v634_v47 = vadd.f32 %v633_v45, %v288_v39  ;;  %v677_v48 = vadd.f32 %v676_v46, %v296_v40  ;;  %v635_v49 = vpop.f32.mrb[2].mxu0  ;;  %v678_v50 = vpop.f32.mrb[2].mxu1 }
 0x11c   : > { %v685_v51 = vmax.f32 %v675_v44, 0.0  ;;  %v636_v52 = vadd.f32 %v635_v49, %v284_v37  ;;  %v679_v53 = vadd.f32 %v678_v50, %v292_v38  ;;  %v637_v54 = vpop.f32.mrb[3].mxu0  ;;  %v680_v55 = vpop.f32.mrb[3].mxu1  ;;  %v683_v59 = vmax.f32 %v632_v43, 0.0 }
 0x11d   : > { %v686_v56 = vmax.f32 %v677_v48, 0.0  ;;  %v638_v57 = vadd.f32 %v637_v54, %v288_v39  ;;  %v681_v58 = vadd.f32 %v680_v55, %v296_v40  ;;  %v684_v62 = vmax.f32 %v634_v47, 0.0 }
 0x11e   : > { %v687_v60 = vmax.f32 %v636_v52, 0.0  ;;  %v689_v61 = vmax.f32 %v679_v53, 0.0 }
 0x11f   : > { %v688_v63 = vmax.f32 %v638_v57, 0.0  ;;  %v690_v0 = vmax.f32 %v681_v58, 0.0 }
 0x120   : > { %v691_v1 = vadd.f32 %v687_v60, %v683_v59  ;;  %v705_v2 = vadd.f32 %v689_v61, %v685_v51 }
 0x121   : > { %v698_v3 = vadd.f32 %v688_v63, %v684_v62  ;;  %v712_v4 = vadd.f32 %v690_v0, %v686_v56 }
 0x122   : > { %v692_v5 = vrot.slane %v691_v1, 4  ;;  %v706_v6 = vrot.slane %v705_v2, 4 }
 0x123   : > { %v699_v7 = vrot.slane %v698_v3, 4  ;;  %v713_v8 = vrot.slane %v712_v4, 4 }
 0x124   : > { %v693_v9 = vadd.f32 %v692_v5, %v691_v1  ;;  %v707_v10 = vadd.f32 %v706_v6, %v705_v2 }
 0x125   : > { %v700_v11 = vadd.f32 %v699_v7, %v698_v3  ;;  %v714_v12 = vadd.f32 %v713_v8, %v712_v4 }
 0x126   : > { %v694_v13 = vrot.slane %v693_v9, 2  ;;  %v708_v14 = vrot.slane %v707_v10, 2 }
 0x127   : > { %v701_v15 = vrot.slane %v700_v11, 2  ;;  %v715_v16 = vrot.slane %v714_v12, 2 }
 0x128   : > { %v695_v17 = vadd.f32 %v694_v13, %v693_v9  ;;  %v709_v18 = vadd.f32 %v708_v14, %v707_v10 }
 0x129   : > { %v702_v19 = vadd.f32 %v701_v15, %v700_v11  ;;  %v716_v20 = vadd.f32 %v715_v16, %v714_v12 }
 0x12a   : > { %v696_v21 = vrot.slane %v695_v17, 1  ;;  %v710_v22 = vrot.slane %v709_v18, 1 }
 0x12b   : > { %v703_v23 = vrot.slane %v702_v19, 1  ;;  %v717_v24 = vrot.slane %v716_v20, 1 }
 0x12c   : > { %v697_v25 = vadd.f32 %v696_v21, %v695_v17  ;;  %v711_v26 = vadd.f32 %v710_v22, %v709_v18 }
 0x12d   : > { %v704_v27 = vadd.f32 %v703_v23, %v702_v19  ;;  %v718_v28 = vadd.f32 %v717_v24, %v716_v20 }
 0x12e   : > { %v719_v31 = vpack.c.bf16 %v697_v25, %v697_v25  ;;  %v721_v32 = vpack.c.bf16 %v711_v26, %v711_v26 }
 0x12f   : > { %v720_v29 = vpack.c.bf16 %v704_v27, %v704_v27  ;;  %v722_v30 = vpack.c.bf16 %v718_v28, %v718_v28 }
 0x131   : > { %1012 = vmatprep.mubr.bf16.mxu0 %v720_v29  ;;  %1052 = vmatprep.mubr.bf16.mxu1 %v722_v30 }
 0x132   : > { %1013 = vmatmul.mubr.bf16.vlgmr.msra.gmra.mrb[4].mxu0 %v719_v31  ;;  %1053 = vmatmul.mubr.bf16.vlgmr.msra.gmra.mrb[4].mxu1 %v721_v32 }
 0x205   : > { %v1249_v33 = vpop.f32.mrb[4].mxu0  ;;  %v1271_v34 = vpop.f32.mrb[4].mxu1 }
 0x206   : > { %v1250_v36 = vpop.f32.mrb[5].mxu0  ;;  %v1272_v37 = vpop.f32.mrb[5].mxu1 }
 0x207   : > { %v1251_v38 = vadd.f32 %v1250_v36, %v1249_v33  ;;  %v1273_v39 = vadd.f32 %v1272_v37, %v1271_v34  ;;  %v1252_v40 = vpop.f32.mrb[6].mxu0  ;;  %v1274_v41 = vpop.f32.mrb[6].mxu1 }
 0x208   : > { %v1253_v42 = vpop.f32.mrb[7].mxu0  ;;  %v1275_v43 = vpop.f32.mrb[7].mxu1 }
 0x209   : > { %v1015_v44 = vadd.f32 %v1251_v38, %v787_v35 }
 0x20b   : > { %v1055_v45 = vadd.f32 %v1273_v39, %v1015_v44 }
 0x20d   : > { %1060 = vst [vmem:[%s216_s10] sm:$0x1] %v1055_v45 }
 0x20e   : > { %1446 = shalt.err (!%p1443_p3)
}
 0x20f   : > { %s1447_s7 = scalar_lea.hbm %s1858_s25, 16  ;;  %s1451_s11 = scalar_lea.hbm %s1905_s5, 32 }
 0x210   : > { %p1448_p4 = scmp.ne.s32.totalorder %s1858_s25, %s1447_s7  ;;  %p1452_p9 = scmp.lt.u32.totalorder %s1858_s25, %s1905_s5 }
 0x211   : > { %p1453_p10 = scmp.lt.u32.totalorder %s1451_s11, %s1447_s7  ;;  %p1455_p12 = scmp.lt.u32.totalorder %s1447_s7, %s1858_s25 }
 0x212   : > { %p1449_p7 = pnand %p1448_p4, %p1566_p5 }
 0x213   : > { %p1454_p11 = por %p1453_p10, %p1452_p9 }
 0x214   : > { %p1450_p8 = pneg %p1449_p7 }
 0x215   : > { %p1456_p13 = por %p1455_p12, %p1454_p11 }
 0x217   : > { %p1457_p0 = pnand %p1456_p13, %p1450_p8 }
 0x219   : > { %1460 = shalt.err (!%p1457_p0)
}
 0x21a   : > { %1277 = dma.vmem_to_hbm [thread:$0]  (%p1566_p5), %s1860_s15, 16, %s1858_s25, %s1062_s17  }
 0x21b PF: > { %p1283_p1 = scmp.ge.s32.totalorder %s1495_s21, 2  ;;  %s1086_s14 = sand.u32 1, %s1483_s18  }
 0x21c   : > { %s1087_s10 = scalar_lea.sflag [#allocation3], %s1086_s14 }
 0x21d   : > { %p1280_p2 = pnand %p1283_p1, %p1570_p6 }
 0x21f   : > { %1478 = dma.done.wait (!%p1280_p2), %s1087_s10, 16  }
 0x220   : > { %1480 = vsyncadd (!%p1280_p2), %s1087_s10, 4294967280  ;;  %p15_p3 = scmp.ge.s32.totalorder %s1553_s24, 4   ;;  %s1908_s18 = smov %s1487_s19 }
 0x221   : > { %s1909_s19 = smov %s1491_s20  ;;  %s1910_s20 = smov %s1564_s27 }
 0x222   : > { %s1911_s21 = smov %s1553_s24  ;;  %17 = sbr.rel (!%p15_p3) target bundleno = 3 (0x3), region = 75 }
 0x229   :  { %1091 = vsyncpa [#allocation3], 1 }
 0x22a   :  { %1093 = vsyncpa [#allocation3 + $0x1], 1 }

</bundles_post_ra>
